<compile_context>
chip_gen: v7x
topology: tpu7x:2x2x1
jax: 0.10.0
libtpu: 0.0.40
codegen_flags: <defaults>
</compile_context>

<pallas_src>
import functools

import jax
import jax.numpy as jnp
from jax.experimental import pallas as pl
from jax.experimental.pallas import tpu as pltpu


def _reg_head_kernel(x_ref, w_ref, b_ref, o_ref, acc_ref, *, inv_hw):
    # x_ref:   (TB, C, THW)  activation tile (f32 or bf16)
    # w_ref:   (1, C)        f32 linear weight (out_features == 1)
    # b_ref:   (1, 1)        f32 bias, in SMEM
    # o_ref:   (TB, 1)       f32 output block (written once per batch tile)
    # acc_ref: (TB, C, 128)  f32 lane-resident partial-sum accumulator
    hw_i = pl.program_id(1)

    @pl.when(hw_i == 0)
    def _init():
        acc_ref[...] = jnp.zeros_like(acc_ref)

    thw = x_ref.shape[-1]
    n_full = thw // 128
    tail = thw - n_full * 128

    # Steady state is pure VPU: fold 128-lane chunks of x into the lane-
    # resident accumulator with elementwise adds (no per-step cross-lane
    # reduce, no (TB, C) relayout).  Chunks are paired to halve the
    # accumulator read-modify-write traffic.  Static slices at 128-aligned
    # lane offsets are free.
    j = 0
    while j + 1 < n_full:
        acc_ref[...] += (
            x_ref[:, :, j * 128:(j + 1) * 128].astype(jnp.float32)
            + x_ref[:, :, (j + 1) * 128:(j + 2) * 128].astype(jnp.float32))
        j += 2
    if j < n_full:
        acc_ref[...] += x_ref[:, :, j * 128:(j + 1) * 128].astype(jnp.float32)
    if tail:  # only in the single-step THW == HW path when HW % 128 != 0
        acc_ref[:, :, :tail] += x_ref[:, :, n_full * 128:].astype(jnp.float32)

    @pl.when(hw_i == pl.num_programs(1) - 1)
    def _finalize():
        # One cross-lane (XLU) reduce + relayout per *batch tile*, off the
        # hot loop.  VPU weighted reduce instead of a degenerate MXU matmul.
        pooled = jnp.sum(acc_ref[...], axis=-1) * inv_hw              # (TB, C)
        out = jnp.sum(pooled * w_ref[...], axis=-1, keepdims=True)    # (TB, 1)
        o_ref[...] = (out + b_ref[0, 0]).astype(o_ref.dtype)


def _choose_tiles(B, C, HW, elt_bytes, max_tile_bytes):
    """Pick (TB, THW, hw_pad).

    Preference (per perf review): THW == HW so each (TB, C, HW) block is one
    fully contiguous HBM copy; shrink TB to meet the byte budget.  Only for
    feature maps too large for a single full row do we tile the spatial axis
    with long, lane-dense chunks (zero-padding HW up to a multiple of 128).
    """
    row_bytes = C * HW * elt_bytes          # one batch row, full spatial extent

    # --- Path 1 (preferred): full-spatial tiles, batch-tiled -------------
    if row_bytes * min(B, 8) <= max_tile_bytes:
        tb_fit = max(1, max_tile_bytes // row_bytes)
        if B >= 16:
            # v7x megacore: keep >= 2 blocks on the "parallel" batch axis.
            cap2 = (((B + 1) // 2 + 7) // 8) * 8    # ceil(ceil(B/2)/8)*8 < B
        else:
            cap2 = B
        if tb_fit >= B:
            tb = min(B, cap2)
        else:
            tb = max(8, (tb_fit // 8) * 8)          # nb > 1 -> multiple of 8
            tb = min(tb, cap2)
        tb = min(tb, 128)      # keeps the (TB, C, 128) f32 accumulator <= ~6 MiB
        return tb, HW, 0

    # --- Path 2 (fallback): spatial tiling for very large feature maps ---
    tb = B if B <= 8 else 8
    hw_pad = (-HW) % 128                    # zero padding is mean-safe (1/HW below)
    n_lanes = (HW + hw_pad) // 128
    max_thw = max(128, min(4096, max_tile_bytes // (tb * C * elt_bytes)))
    thw = 128
    for d in range(1, n_lanes + 1):         # largest 128-multiple divisor in budget
        if n_lanes % d == 0 and 128 * d <= max_thw:
            thw = 128 * d
    return tb, thw, hw_pad


def ref_head_v1_forward(x_nchw, weight, bias, *, max_tile_bytes=16 * 1024 * 1024):
    """x_nchw: (B, C, H, W) (f32 or bf16); weight: (1, C) / (C,); bias: (1,).

    Returns (B, 1) f32.  max_tile_bytes bounds one (double-buffered) x tile;
    the 16 MiB default plus the <= 6 MiB accumulator stays well inside the
    48 MiB vmem_limit (v7x has 64 MiB per TC, v5e/v6e have 128 MiB).
    """
    B, C, H, W = x_nchw.shape
    HW = H * W

    # Layout-only reshape (free); NO dtype cast — bf16 stays bf16 in HBM.
    x = x_nchw.reshape(B, C, HW)
    w = weight.reshape(1, C).astype(jnp.float32)
    b = bias.reshape(1, 1).astype(jnp.float32)

    elt = jnp.dtype(x.dtype).itemsize
    TB, THW, hw_pad = _choose_tiles(B, C, HW, elt, max_tile_bytes)
    if hw_pad:
        # Only on the large-feature-map fallback path; zeros don't bias the
        # mean because inv_hw below uses the true HW.
        x = jnp.pad(x, ((0, 0), (0, 0), (0, hw_pad)))
    hw_total = HW + hw_pad
    assert hw_total % THW == 0, "spatial tile must divide the (padded) extent"
    nhw = hw_total // THW
    nb = pl.cdiv(B, TB)

    kernel = functools.partial(_reg_head_kernel, inv_hw=1.0 / float(HW))

    grid_spec = pltpu.PrefetchScalarGridSpec(
        num_scalar_prefetch=0,
        grid=(nb, nhw),                                  # reduction (HW) axis last
        in_specs=[
            pl.BlockSpec((TB, C, THW), lambda bi, hwi: (bi, 0, hwi)),
            pl.BlockSpec((1, C), lambda bi, hwi: (0, 0)),
            pl.BlockSpec(memory_space=pltpu.MemorySpace.SMEM),   # bias scalar
        ],
        out_specs=pl.BlockSpec((TB, 1), lambda bi, hwi: (bi, 0)),
        scratch_shapes=[pltpu.VMEM((TB, C, 128), jnp.float32)],
    )

    cost = pl.CostEstimate(
        flops=2 * B * C * HW + 2 * B * C,
        transcendentals=0,
        bytes_accessed=B * C * HW * elt + C * 4 + 4 + B * 4,
    )

    out = pl.pallas_call(
        kernel,
        out_shape=jax.ShapeDtypeStruct((B, 1), jnp.float32),
        grid_spec=grid_spec,
        compiler_params=pltpu.CompilerParams(
            dimension_semantics=("parallel", "arbitrary"),   # batch across TCs (v7x)
            vmem_limit_bytes=48 * 1024 * 1024,
        ),
        cost_estimate=cost,
    )(x, w, b)

    return out                                # (B, 1) f32


if __name__ == "__main__":
    key = jax.random.PRNGKey(0)
    kx1, kx2, kx3, kw, kb = jax.random.split(key, 5)

    C = 96  # num_tokens in the PyTorch module

    # Deterministic nn.Linear(96, 1)-style init: U(-1/sqrt(C), 1/sqrt(C)).
    bound = 1.0 / (C ** 0.5)
    weight = jax.random.uniform(kw, (1, C), minval=-bound, maxval=bound,
                                dtype=jnp.float32)
    bias = jax.random.uniform(kb, (1,), minval=-bound, maxval=bound,
                              dtype=jnp.float32)

    def reference(xin):
        xb = xin.astype(jnp.float32).reshape(xin.shape[0], C, -1)
        pooled = jnp.mean(xb, axis=-1)                       # (B, C)
        return pooled @ weight.T + bias                      # (B, 1)

    # Case 1: f32, contiguous full-spatial tile (single HW step).
    B, H, W = 2, 32, 32
    x1 = jax.random.normal(kx1, (B, C, H, W), dtype=jnp.float32)
    out1 = jax.block_until_ready(ref_head_v1_forward(x1, weight, bias))
    assert out1.shape == (B, 1)
    assert jnp.allclose(out1, reference(x1), atol=1e-5, rtol=1e-5)

    # Case 1b: tiny tile budget forces the multi-step HW reduction path
    # (exercises accumulator init / VPU lane-fold / finalize).
    out1b = jax.block_until_ready(
        ref_head_v1_forward(x1, weight, bias, max_tile_bytes=256 * 1024))
    assert jnp.allclose(out1b, reference(x1), atol=1e-5, rtol=1e-5)

    # Case 2: bf16 activations, HW not a multiple of 128 (tail-lane path);
    # no wrapper upcast, f32 accumulation in-kernel.
    x2 = jax.random.normal(kx2, (2, C, 8, 8),
                           dtype=jnp.float32).astype(jnp.bfloat16)
    out2 = jax.block_until_ready(ref_head_v1_forward(x2, weight, bias))
    assert out2.shape == (2, 1)
    assert jnp.allclose(out2, reference(x2), atol=1e-3, rtol=1e-3)

    # Case 3: batch split into >= 2 blocks with a non-dividing remainder
    # (exercises the "parallel" batch axis + edge-block handling).
    x3 = jax.random.normal(kx3, (20, C, 16, 16), dtype=jnp.float32)
    out3 = jax.block_until_ready(ref_head_v1_forward(x3, weight, bias))
    assert out3.shape == (20, 1)
    assert jnp.allclose(out3, reference(x3), atol=1e-5, rtol=1e-5)

    print("KERNEL_OK")
</pallas_src>

<mosaic_0001>
module attributes {stable_mosaic.version = 11 : i64} {
  func.func @_reg_head_kernel(%arg0: i32, %arg1: i32, %arg2: memref<2x96x1024xf32, #tpu.memory_space<vmem>>, %arg3: memref<1x96xf32, #tpu.memory_space<vmem>>, %arg4: memref<1x1xf32, #tpu.memory_space<smem>>, %arg5: memref<2x1xf32, #tpu.memory_space<vmem>>, %arg6: memref<2x96x128xf32, #tpu.memory_space<vmem>>) attributes {dimension_semantics = [#tpu.dimension_semantics<parallel>, #tpu.dimension_semantics<arbitrary>], iteration_bounds = array<i64: 1, 1>, scalar_prefetch = 0 : i64, scratch_operands = 1 : i64, tpu.core_type = #tpu.core_type<tc>, window_params = [{transform_indices = @transform_0, window_bounds = array<i64: 2, 96, 1024>}, {pipeline_mode = #tpu.pipeline_mode<synchronous>, transform_indices = @transform_1, window_bounds = array<i64: 1, 96>}, {transform_indices = @transform_2, window_bounds = array<i64: 1, 1>}, {transform_indices = @transform_3, window_bounds = array<i64: 2, 1>}]} {
    %c0_i32 = arith.constant 0 : i32
    %0 = arith.cmpi eq, %arg1, %c0_i32 : i32
    %1 = arith.extui %0 : i1 to i32
    %c0_i32_0 = arith.constant 0 : i32
    %2 = arith.cmpi ne, %1, %c0_i32_0 : i32
    scf.if %2 {
      %cst = arith.constant 0.000000e+00 : f32
      %30 = vector.broadcast %cst : f32 to vector<2x96x128xf32>
      %c0_43 = arith.constant 0 : index
      %c0_44 = arith.constant 0 : index
      %c0_45 = arith.constant 0 : index
      %31 = vector.load %arg6[%c0_43, %c0_44, %c0_45] : memref<2x96x128xf32, #tpu.memory_space<vmem>>, vector<2x96x128xf32>
      tpu.vector_store %arg6[%c0_43, %c0_44, %c0_45], %30 {strides = array<i32>} : memref<2x96x128xf32, #tpu.memory_space<vmem>>, vector<2x96x128xf32>,
    } else {
    }
    %c0 = arith.constant 0 : index
    %c0_1 = arith.constant 0 : index
    %c0_2 = arith.constant 0 : index
    %3 = vector.load %arg6[%c0, %c0_1, %c0_2] : memref<2x96x128xf32, #tpu.memory_space<vmem>>, vector<2x96x128xf32>
    %c0_3 = arith.constant 0 : index
    %c0_4 = arith.constant 0 : index
    %c0_5 = arith.constant 0 : index
    %4 = vector.load %arg2[%c0_3, %c0_4, %c0_5] : memref<2x96x1024xf32, #tpu.memory_space<vmem>>, vector<2x96x128xf32>
    %c0_6 = arith.constant 0 : index
    %c0_7 = arith.constant 0 : index
    %c128 = arith.constant 128 : index
    %5 = vector.load %arg2[%c0_6, %c0_7, %c128] : memref<2x96x1024xf32, #tpu.memory_space<vmem>>, vector<2x96x128xf32>
    %6 = arith.addf %4, %5 : vector<2x96x128xf32>
    %7 = arith.addf %3, %6 : vector<2x96x128xf32>
    %c0_8 = arith.constant 0 : index
    %c0_9 = arith.constant 0 : index
    %c0_10 = arith.constant 0 : index
    %8 = vector.load %arg6[%c0_8, %c0_9, %c0_10] : memref<2x96x128xf32, #tpu.memory_space<vmem>>, vector<2x96x128xf32>
    tpu.vector_store %arg6[%c0_8, %c0_9, %c0_10], %7 {strides = array<i32>} : memref<2x96x128xf32, #tpu.memory_space<vmem>>, vector<2x96x128xf32>,
    %c0_11 = arith.constant 0 : index
    %c0_12 = arith.constant 0 : index
    %c0_13 = arith.constant 0 : index
    %9 = vector.load %arg6[%c0_11, %c0_12, %c0_13] : memref<2x96x128xf32, #tpu.memory_space<vmem>>, vector<2x96x128xf32>
    %c0_14 = arith.constant 0 : index
    %c0_15 = arith.constant 0 : index
    %c256 = arith.constant 256 : index
    %10 = vector.load %arg2[%c0_14, %c0_15, %c256] : memref<2x96x1024xf32, #tpu.memory_space<vmem>>, vector<2x96x128xf32>
    %c0_16 = arith.constant 0 : index
    %c0_17 = arith.constant 0 : index
    %c384 = arith.constant 384 : index
    %11 = vector.load %arg2[%c0_16, %c0_17, %c384] : memref<2x96x1024xf32, #tpu.memory_space<vmem>>, vector<2x96x128xf32>
    %12 = arith.addf %10, %11 : vector<2x96x128xf32>
    %13 = arith.addf %9, %12 : vector<2x96x128xf32>
    %c0_18 = arith.constant 0 : index
    %c0_19 = arith.constant 0 : index
    %c0_20 = arith.constant 0 : index
    %14 = vector.load %arg6[%c0_18, %c0_19, %c0_20] : memref<2x96x128xf32, #tpu.memory_space<vmem>>, vector<2x96x128xf32>
    tpu.vector_store %arg6[%c0_18, %c0_19, %c0_20], %13 {strides = array<i32>} : memref<2x96x128xf32, #tpu.memory_space<vmem>>, vector<2x96x128xf32>,
    %c0_21 = arith.constant 0 : index
    %c0_22 = arith.constant 0 : index
    %c0_23 = arith.constant 0 : index
    %15 = vector.load %arg6[%c0_21, %c0_22, %c0_23] : memref<2x96x128xf32, #tpu.memory_space<vmem>>, vector<2x96x128xf32>
    %c0_24 = arith.constant 0 : index
    %c0_25 = arith.constant 0 : index
    %c512 = arith.constant 512 : index
    %16 = vector.load %arg2[%c0_24, %c0_25, %c512] : memref<2x96x1024xf32, #tpu.memory_space<vmem>>, vector<2x96x128xf32>
    %c0_26 = arith.constant 0 : index
    %c0_27 = arith.constant 0 : index
    %c640 = arith.constant 640 : index
    %17 = vector.load %arg2[%c0_26, %c0_27, %c640] : memref<2x96x1024xf32, #tpu.memory_space<vmem>>, vector<2x96x128xf32>
    %18 = arith.addf %16, %17 : vector<2x96x128xf32>
    %19 = arith.addf %15, %18 : vector<2x96x128xf32>
    %c0_28 = arith.constant 0 : index
    %c0_29 = arith.constant 0 : index
    %c0_30 = arith.constant 0 : index
    %20 = vector.load %arg6[%c0_28, %c0_29, %c0_30] : memref<2x96x128xf32, #tpu.memory_space<vmem>>, vector<2x96x128xf32>
    tpu.vector_store %arg6[%c0_28, %c0_29, %c0_30], %19 {strides = array<i32>} : memref<2x96x128xf32, #tpu.memory_space<vmem>>, vector<2x96x128xf32>,
    %c0_31 = arith.constant 0 : index
    %c0_32 = arith.constant 0 : index
    %c0_33 = arith.constant 0 : index
    %21 = vector.load %arg6[%c0_31, %c0_32, %c0_33] : memref<2x96x128xf32, #tpu.memory_space<vmem>>, vector<2x96x128xf32>
    %c0_34 = arith.constant 0 : index
    %c0_35 = arith.constant 0 : index
    %c768 = arith.constant 768 : index
    %22 = vector.load %arg2[%c0_34, %c0_35, %c768] : memref<2x96x1024xf32, #tpu.memory_space<vmem>>, vector<2x96x128xf32>
    %c0_36 = arith.constant 0 : index
    %c0_37 = arith.constant 0 : index
    %c896 = arith.constant 896 : index
    %23 = vector.load %arg2[%c0_36, %c0_37, %c896] : memref<2x96x1024xf32, #tpu.memory_space<vmem>>, vector<2x96x128xf32>
    %24 = arith.addf %22, %23 : vector<2x96x128xf32>
    %25 = arith.addf %21, %24 : vector<2x96x128xf32>
    %c0_38 = arith.constant 0 : index
    %c0_39 = arith.constant 0 : index
    %c0_40 = arith.constant 0 : index
    %26 = vector.load %arg6[%c0_38, %c0_39, %c0_40] : memref<2x96x128xf32, #tpu.memory_space<vmem>>, vector<2x96x128xf32>
    tpu.vector_store %arg6[%c0_38, %c0_39, %c0_40], %25 {strides = array<i32>} : memref<2x96x128xf32, #tpu.memory_space<vmem>>, vector<2x96x128xf32>,
    %c0_i32_41 = arith.constant 0 : i32
    %27 = arith.cmpi eq, %arg1, %c0_i32_41 : i32
    %28 = arith.extui %27 : i1 to i32
    %c0_i32_42 = arith.constant 0 : i32
    %29 = arith.cmpi ne, %28, %c0_i32_42 : i32
    scf.if %29 {
      %c0_43 = arith.constant 0 : index
      %c0_44 = arith.constant 0 : index
      %c0_45 = arith.constant 0 : index
      %30 = vector.load %arg6[%c0_43, %c0_44, %c0_45] : memref<2x96x128xf32, #tpu.memory_space<vmem>>, vector<2x96x128xf32>
      %cst = arith.constant dense<0.000000e+00> : vector<2x96xf32>
      %31 = vector.multi_reduction <add>, %30, %cst [2] : vector<2x96x128xf32> to vector<2x96xf32>
      %cst_46 = arith.constant 9.765625E-4 : f32
      %32 = vector.broadcast %cst_46 : f32 to vector<2x96xf32>
      %33 = arith.mulf %31, %32 : vector<2x96xf32>
      %c0_47 = arith.constant 0 : index
      %c0_48 = arith.constant 0 : index
      %34 = vector.load %arg3[%c0_47, %c0_48] : memref<1x96xf32, #tpu.memory_space<vmem>>, vector<1x96xf32>
      %35 = vector.broadcast %34 : vector<1x96xf32> to vector<2x96xf32>
      %36 = arith.mulf %33, %35 : vector<2x96xf32>
      %cst_49 = arith.constant dense<0.000000e+00> : vector<2xf32>
      %37 = vector.multi_reduction <add>, %36, %cst_49 [1] : vector<2x96xf32> to vector<2xf32>
      %38 = vector.shape_cast %37 : vector<2xf32> to vector<2x1xf32>
      %c0_50 = arith.constant 0 : index
      %c0_51 = arith.constant 0 : index
      %39 = memref.load %arg4[%c0_50, %c0_51] : memref<1x1xf32, #tpu.memory_space<smem>>
      %40 = vector.broadcast %39 : f32 to vector<2x1xf32>
      %41 = arith.addf %38, %40 : vector<2x1xf32>
      %c0_52 = arith.constant 0 : index
      %c0_53 = arith.constant 0 : index
      %42 = vector.load %arg5[%c0_52, %c0_53] : memref<2x1xf32, #tpu.memory_space<vmem>>, vector<2x1xf32>
      tpu.vector_store %arg5[%c0_52, %c0_53], %41 {strides = array<i32>} : memref<2x1xf32, #tpu.memory_space<vmem>>, vector<2x1xf32>,
    } else {
    }
    return
  }
  func.func @transform_0(%arg0: i32, %arg1: i32) -> (i32, i32, i32) {
    %c0_i32 = arith.constant 0 : i32
    %c0_i32_0 = arith.constant 0 : i32
    return %arg0, %c0_i32, %arg1 : i32, i32, i32
  }
  func.func @transform_1(%arg0: i32, %arg1: i32) -> (i32, i32) {
    %c0_i32 = arith.constant 0 : i32
    %c0_i32_0 = arith.constant 0 : i32
    %c0_i32_1 = arith.constant 0 : i32
    return %c0_i32, %c0_i32_0 : i32, i32
  }
  func.func @transform_2(%arg0: i32, %arg1: i32) -> (i32, i32) {
    %c0_i32 = arith.constant 0 : i32
    %c0_i32_0 = arith.constant 0 : i32
    %c0_i32_1 = arith.constant 0 : i32
    return %c0_i32, %c0_i32_0 : i32, i32
  }
  func.func @transform_3(%arg0: i32, %arg1: i32) -> (i32, i32) {
    %c0_i32 = arith.constant 0 : i32
    %c0_i32_0 = arith.constant 0 : i32
    return %arg0, %c0_i32 : i32, i32
  }
}

</mosaic_0001>

<bundles_post_ra>
// kernel: tpu_custom_call.1
= control target key start
LH: loop header
LB: loop body
LE: loop exit
PB: predicated region body
PF: predicated region fallthrough
CT: control target
= control target key end

     0   :  { %9 = vsyncpa [#allocation5], 0  ;;  %s1107_s12 = smov [#allocation4]   ;;  %s1240_s0 = inlined_call_operand.hbm [shape: f32[2,96,1024], index: 0, kind: input, shape index: {}]   ;;  %s1241_s1 = inlined_call_operand.vmem [shape: f32[1,96], index: 1, kind: input, shape index: {}]   ;;  %s1242_s2 = inlined_call_operand.<no memory space> [shape: f32[1,1], index: 2, kind: input, shape index: {}]   ;;  %s1243_s3 = inlined_call_operand.vmem [shape: f32[2,1], index: 3, kind: output, shape index: {}]  }
   0x1   :  { %s15_s13 = sshll.u32 %s1107_s12, 4  ;;  %s1083_s16 = scalar_lea.hbm %s1240_s0, 24576  ;;  %s16_s13 = int_to_ptr.vmem [resolvable:$true] %s15_s13 }
   0x2   :  { %p1084_p0 = scmp.ne.s32.totalorder %s1240_s0, %s1083_s16  ;;  %p1087_p1 = scmp.lt.u32.totalorder %s1083_s16, %s1240_s0 }
   0x4   :  { %p1089_p2 = pnand %p1087_p1, %p1084_p0 }
   0x6   :  { %1092 = shalt.err (!%p1089_p2)
}
   0x7   :  { %s1093_s21 = scalar_lea.vmem %s16_s13, 24576  ;;  %p1098_p4 = scmp.lt.s32.totalorder %s16_s13, %s16_s13 }
   0x8   :  { %p1094_p3 = scmp.ne.s32.totalorder %s16_s13, %s1093_s21  ;;  %p1099_p5 = scmp.lt.s32.totalorder %s1093_s21, %s1093_s21 }
   0xa   :  { %p1100_p6 = por %p1099_p5, %p1098_p4 }
   0xc   :  { %p1101_p7 = pnand %p1100_p6, %p1094_p3 }
   0xe   :  { %1104 = shalt.err (!%p1101_p7)
}
   0xf   :  { %s1108_s22 = smov 1024   ;;  %s1109_s23 = smov 64  }
  0x10   :  { %21 = dma.hbm_to_vmem [thread:$0]  %s1240_s0, 24576, %s16_s13, [#allocation5], %s1108_s22, %s1108_s22, %s1109_s23  }
  0x11   :  { %1105 = dma.done.wait [#allocation5], 24576  }
  0x12   :  { %1106 = vsyncadd [#allocation5], 4294942720  ;;  %v93_v0 = vld [vmem:[#allocation4 + $0x300] sm:$0xff]  ;;  %v117_v1 = vld [vmem:[#allocation4 + $0x308] sm:$0xff]  ;;  %vm928_vm0 = vcmask 130112   ;;  %vm935_vm1 = vcmask 195712  }
  0x13   :  { %v237_v2 = vld [vmem:[#allocation4 + $0x310] sm:$0xff]  ;;  %v141_v3 = vadd.f32 %v117_v1, %v93_v0  ;;  %v261_v4 = vld [vmem:[#allocation4 + $0x318] sm:$0xff]  ;;  %v381_v5 = vld [vmem:[#allocation4 + $0x320] sm:$0xff]  ;;  %vm942_vm2 = vcmask 261312   ;;  %vm949_vm3 = vcmask 326912   ;;  %vm956_vm4 = vcmask 392512  }
  0x14   :  { %v405_v6 = vld [vmem:[#allocation4 + $0x328] sm:$0xff]  ;;  %v285_v7 = vadd.f32 %v261_v4, %v237_v2  ;;  %v525_v9 = vld [vmem:[#allocation4 + $0x330] sm:$0xff]  ;;  %v549_v10 = vld [vmem:[#allocation4 + $0x338] sm:$0xff]  ;;  %vm963_vm5 = vcmask 458112   ;;  %vm970_vm6 = vcmask 523712   ;;  %vm977_vm7 = vcmask 589312  }
  0x15   :  { %v429_v8 = vadd.f32 %v405_v6, %v381_v5  ;;  %v81_v11 = vld [vmem:[#allocation4] sm:$0xff]  ;;  %v105_v12 = vld [vmem:[#allocation4 + $0x8] sm:$0xff]  ;;  %v225_v13 = vld [vmem:[#allocation4 + $0x10] sm:$0xff]  ;;  %v573_v16 = vadd.f32 %v549_v10, %v525_v9  ;;  %vm984_vm8 = vcmask 654912   ;;  %vm991_vm9 = vcmask 720512  }
  0x16   :  { %v249_v14 = vld [vmem:[#allocation4 + $0x18] sm:$0xff]  ;;  %v309_v15 = vadd.f32 %v285_v7, %v141_v3  ;;  %v129_v17 = vadd.f32 %v105_v12, %v81_v11  ;;  %v369_v19 = vld [vmem:[#allocation4 + $0x20] sm:$0xff]  ;;  %v393_v20 = vld [vmem:[#allocation4 + $0x28] sm:$0xff]  ;;  %vm998_vm10 = vcmask 786112   ;;  %vm1059_vm11 = vcmask 1041409  }
  0x17   :  { %v273_v18 = vadd.f32 %v249_v14, %v225_v13  ;;  %v513_v21 = vld [vmem:[#allocation4 + $0x30] sm:$0xff]  ;;  %v417_v22 = vadd.f32 %v393_v20, %v369_v19  ;;  %v537_v23 = vld [vmem:[#allocation4 + $0x38] sm:$0xff]  ;;  %v94_v24 = vld [vmem:[#allocation4 + $0x340] sm:$0xff]  ;;  %vm1062_vm12 = vcmask 779264   ;;  %vm1069_vm13 = vcmask 1024  }
  0x18   :  { %v118_v25 = vld [vmem:[#allocation4 + $0x348] sm:$0xff]  ;;  %v453_v26 = vadd.f32 %v429_v8, %v309_v15  ;;  %v561_v28 = vadd.f32 %v537_v23, %v513_v21  ;;  %v238_v30 = vld [vmem:[#allocation4 + $0x350] sm:$0xff]  ;;  %v262_v31 = vld [vmem:[#allocation4 + $0x358] sm:$0xff] }
  0x19   :  { %v297_v27 = vadd.f32 %v273_v18, %v129_v17  ;;  %v142_v29 = vadd.f32 %v118_v25, %v94_v24  ;;  %v382_v32 = vld [vmem:[#allocation4 + $0x360] sm:$0xff]  ;;  %v286_v33 = vadd.f32 %v262_v31, %v238_v30  ;;  %v406_v34 = vld [vmem:[#allocation4 + $0x368] sm:$0xff]  ;;  %v526_v35 = vld [vmem:[#allocation4 + $0x370] sm:$0xff] }
  0x1a   :  { %v550_v36 = vld [vmem:[#allocation4 + $0x378] sm:$0xff]  ;;  %v597_v37 = vadd.f32 %v573_v16, %v453_v26  ;;  %v430_v39 = vadd.f32 %v406_v34, %v382_v32  ;;  %v82_v40 = vld [vmem:[#allocation4 + $0x40] sm:$0xff]  ;;  %v106_v41 = vld [vmem:[#allocation4 + $0x48] sm:$0xff] }
  0x1b   :  { %v441_v38 = vadd.f32 %v417_v22, %v297_v27  ;;  %v226_v42 = vld [vmem:[#allocation4 + $0x50] sm:$0xff]  ;;  %v310_v43 = vadd.f32 %v286_v33, %v142_v29  ;;  %v574_v44 = vadd.f32 %v550_v36, %v526_v35  ;;  %v130_v45 = vadd.f32 %v106_v41, %v82_v40  ;;  %v250_v46 = vld [vmem:[#allocation4 + $0x58] sm:$0xff]  ;;  %v370_v47 = vld [vmem:[#allocation4 + $0x60] sm:$0xff] }
  0x1c   :  { %v394_v48 = vld [vmem:[#allocation4 + $0x68] sm:$0xff]  ;;  %684 = vadd.xlane.f32.xlu1 %v597_v37  ;;  %v274_v50 = vadd.f32 %v250_v46, %v226_v42  ;;  %v514_v52 = vld [vmem:[#allocation4 + $0x70] sm:$0xff]  ;;  %v538_v53 = vld [vmem:[#allocation4 + $0x78] sm:$0xff] }
  0x1d   :  { %v585_v49 = vadd.f32 %v561_v28, %v441_v38  ;;  %v418_v51 = vadd.f32 %v394_v48, %v370_v47  ;;  %v95_v54 = vld [vmem:[#allocation4 + $0x380] sm:$0xff]  ;;  %v454_v55 = vadd.f32 %v430_v39, %v310_v43  ;;  %v119_v56 = vld [vmem:[#allocation4 + $0x388] sm:$0xff]  ;;  %v239_v57 = vld [vmem:[#allocation4 + $0x390] sm:$0xff]  ;;  %v562_v60 = vadd.f32 %v538_v53, %v514_v52 }
  0x1e   :  { %v263_v58 = vld [vmem:[#allocation4 + $0x398] sm:$0xff]  ;;  %v298_v59 = vadd.f32 %v274_v50, %v130_v45  ;;  %v143_v61 = vadd.f32 %v119_v56, %v95_v54  ;;  %v383_v63 = vld [vmem:[#allocation4 + $0x3a0] sm:$0xff]  ;;  %v407_v0 = vld [vmem:[#allocation4 + $0x3a8] sm:$0xff] }
  0x1f   :  { %660 = vadd.xlane.f32.xlu0 %v585_v49  ;;  %v287_v62 = vadd.f32 %v263_v58, %v239_v57  ;;  %v527_v1 = vld [vmem:[#allocation4 + $0x3b0] sm:$0xff]  ;;  %v598_v2 = vadd.f32 %v574_v44, %v454_v55  ;;  %v431_v3 = vadd.f32 %v407_v0, %v383_v63  ;;  %v551_v4 = vld [vmem:[#allocation4 + $0x3b8] sm:$0xff]  ;;  %v83_v5 = vld [vmem:[#allocation4 + $0x80] sm:$0xff] }
  0x20   :  { %v107_v6 = vld [vmem:[#allocation4 + $0x88] sm:$0xff]  ;;  %v442_v7 = vadd.f32 %v418_v51, %v298_v59  ;;  %v575_v9 = vadd.f32 %v551_v4, %v527_v1  ;;  %v227_v11 = vld [vmem:[#allocation4 + $0x90] sm:$0xff]  ;;  %v251_v12 = vld [vmem:[#allocation4 + $0x98] sm:$0xff] }
  0x21   :  { %v311_v8 = vadd.f32 %v287_v62, %v143_v61  ;;  %v131_v10 = vadd.f32 %v107_v6, %v83_v5  ;;  %v371_v13 = vld [vmem:[#allocation4 + $0xa0] sm:$0xff]  ;;  %686 = vadd.xlane.f32.xlu1 %v598_v2  ;;  %v275_v14 = vadd.f32 %v251_v12, %v227_v11  ;;  %v395_v15 = vld [vmem:[#allocation4 + $0xa8] sm:$0xff]  ;;  %v515_v16 = vld [vmem:[#allocation4 + $0xb0] sm:$0xff] }
  0x22   :  { %v539_v17 = vld [vmem:[#allocation4 + $0xb8] sm:$0xff]  ;;  %v586_v18 = vadd.f32 %v562_v60, %v442_v7  ;;  %v419_v20 = vadd.f32 %v395_v15, %v371_v13  ;;  %v96_v21 = vld [vmem:[#allocation4 + $0x3c0] sm:$0xff]  ;;  %v120_v22 = vld [vmem:[#allocation4 + $0x3c8] sm:$0xff] }
  0x23   :  { %v455_v19 = vadd.f32 %v431_v3, %v311_v8  ;;  %v240_v23 = vld [vmem:[#allocation4 + $0x3d0] sm:$0xff]  ;;  %v299_v24 = vadd.f32 %v275_v14, %v131_v10  ;;  %v563_v25 = vadd.f32 %v539_v17, %v515_v16  ;;  %v144_v26 = vadd.f32 %v120_v22, %v96_v21  ;;  %v264_v27 = vld [vmem:[#allocation4 + $0x3d8] sm:$0xff]  ;;  %v384_v28 = vld [vmem:[#allocation4 + $0x3e0] sm:$0xff] }
  0x24   :  { %v408_v29 = vld [vmem:[#allocation4 + $0x3e8] sm:$0xff]  ;;  %662 = vadd.xlane.f32.xlu0 %v586_v18  ;;  %v288_v31 = vadd.f32 %v264_v27, %v240_v23  ;;  %v528_v33 = vld [vmem:[#allocation4 + $0x3f0] sm:$0xff]  ;;  %v552_v34 = vld [vmem:[#allocation4 + $0x3f8] sm:$0xff] }
  0x25   :  { %v599_v30 = vadd.f32 %v575_v9, %v455_v19  ;;  %v432_v32 = vadd.f32 %v408_v29, %v384_v28  ;;  %v84_v35 = vld [vmem:[#allocation4 + $0xc0] sm:$0xff]  ;;  %v443_v36 = vadd.f32 %v419_v20, %v299_v24  ;;  %v108_v37 = vld [vmem:[#allocation4 + $0xc8] sm:$0xff]  ;;  %v228_v38 = vld [vmem:[#allocation4 + $0xd0] sm:$0xff]  ;;  %v576_v41 = vadd.f32 %v552_v34, %v528_v33 }
  0x26   :  { %v252_v39 = vld [vmem:[#allocation4 + $0xd8] sm:$0xff]  ;;  %v312_v40 = vadd.f32 %v288_v31, %v144_v26  ;;  %v132_v42 = vadd.f32 %v108_v37, %v84_v35  ;;  %v372_v44 = vld [vmem:[#allocation4 + $0xe0] sm:$0xff]  ;;  %v396_v45 = vld [vmem:[#allocation4 + $0xe8] sm:$0xff] }
  0x27   :  { %688 = vadd.xlane.f32.xlu1 %v599_v30  ;;  %v276_v43 = vadd.f32 %v252_v39, %v228_v38  ;;  %v516_v46 = vld [vmem:[#allocation4 + $0xf0] sm:$0xff]  ;;  %v587_v47 = vadd.f32 %v563_v25, %v443_v36  ;;  %v420_v48 = vadd.f32 %v396_v45, %v372_v44  ;;  %v540_v49 = vld [vmem:[#allocation4 + $0xf8] sm:$0xff]  ;;  %v97_v50 = vld [vmem:[#allocation4 + $0x400] sm:$0xff] }
  0x28   :  { %v121_v51 = vld [vmem:[#allocation4 + $0x408] sm:$0xff]  ;;  %v456_v52 = vadd.f32 %v432_v32, %v312_v40  ;;  %v564_v54 = vadd.f32 %v540_v49, %v516_v46  ;;  %v241_v56 = vld [vmem:[#allocation4 + $0x410] sm:$0xff]  ;;  %v265_v57 = vld [vmem:[#allocation4 + $0x418] sm:$0xff] }
  0x29   :  { %v300_v53 = vadd.f32 %v276_v43, %v132_v42  ;;  %v145_v55 = vadd.f32 %v121_v51, %v97_v50  ;;  %v385_v58 = vld [vmem:[#allocation4 + $0x420] sm:$0xff]  ;;  %664 = vadd.xlane.f32.xlu0 %v587_v47  ;;  %v289_v59 = vadd.f32 %v265_v57, %v241_v56  ;;  %v409_v60 = vld [vmem:[#allocation4 + $0x428] sm:$0xff]  ;;  %v529_v61 = vld [vmem:[#allocation4 + $0x430] sm:$0xff] }
  0x2a   :  { %v553_v62 = vld [vmem:[#allocation4 + $0x438] sm:$0xff]  ;;  %v600_v63 = vadd.f32 %v576_v41, %v456_v52  ;;  %v433_v1 = vadd.f32 %v409_v60, %v385_v58  ;;  %v85_v2 = vld [vmem:[#allocation4 + $0x100] sm:$0xff]  ;;  %v109_v3 = vld [vmem:[#allocation4 + $0x108] sm:$0xff] }
  0x2b   :  { %v444_v0 = vadd.f32 %v420_v48, %v300_v53  ;;  %v229_v4 = vld [vmem:[#allocation4 + $0x110] sm:$0xff]  ;;  %v313_v5 = vadd.f32 %v289_v59, %v145_v55  ;;  %v577_v6 = vadd.f32 %v553_v62, %v529_v61  ;;  %v133_v7 = vadd.f32 %v109_v3, %v85_v2  ;;  %v253_v8 = vld [vmem:[#allocation4 + $0x118] sm:$0xff]  ;;  %v373_v9 = vld [vmem:[#allocation4 + $0x120] sm:$0xff] }
  0x2c   :  { %v397_v10 = vld [vmem:[#allocation4 + $0x128] sm:$0xff]  ;;  %690 = vadd.xlane.f32.xlu1 %v600_v63  ;;  %v277_v12 = vadd.f32 %v253_v8, %v229_v4  ;;  %v517_v14 = vld [vmem:[#allocation4 + $0x130] sm:$0xff]  ;;  %v541_v15 = vld [vmem:[#allocation4 + $0x138] sm:$0xff] }
  0x2d   :  { %v588_v11 = vadd.f32 %v564_v54, %v444_v0  ;;  %v421_v13 = vadd.f32 %v397_v10, %v373_v9  ;;  %v98_v16 = vld [vmem:[#allocation4 + $0x440] sm:$0xff]  ;;  %v457_v17 = vadd.f32 %v433_v1, %v313_v5  ;;  %v122_v18 = vld [vmem:[#allocation4 + $0x448] sm:$0xff]  ;;  %v242_v19 = vld [vmem:[#allocation4 + $0x450] sm:$0xff]  ;;  %v565_v22 = vadd.f32 %v541_v15, %v517_v14 }
  0x2e   :  { %v266_v20 = vld [vmem:[#allocation4 + $0x458] sm:$0xff]  ;;  %v301_v21 = vadd.f32 %v277_v12, %v133_v7  ;;  %v146_v23 = vadd.f32 %v122_v18, %v98_v16  ;;  %v386_v25 = vld [vmem:[#allocation4 + $0x460] sm:$0xff]  ;;  %v410_v26 = vld [vmem:[#allocation4 + $0x468] sm:$0xff] }
  0x2f   :  { %666 = vadd.xlane.f32.xlu0 %v588_v11  ;;  %v290_v24 = vadd.f32 %v266_v20, %v242_v19  ;;  %v530_v27 = vld [vmem:[#allocation4 + $0x470] sm:$0xff]  ;;  %v601_v28 = vadd.f32 %v577_v6, %v457_v17  ;;  %v434_v29 = vadd.f32 %v410_v26, %v386_v25  ;;  %v554_v30 = vld [vmem:[#allocation4 + $0x478] sm:$0xff]  ;;  %v86_v31 = vld [vmem:[#allocation4 + $0x140] sm:$0xff] }
  0x30   :  { %v110_v32 = vld [vmem:[#allocation4 + $0x148] sm:$0xff]  ;;  %v445_v33 = vadd.f32 %v421_v13, %v301_v21  ;;  %v578_v35 = vadd.f32 %v554_v30, %v530_v27  ;;  %v230_v37 = vld [vmem:[#allocation4 + $0x150] sm:$0xff]  ;;  %v254_v38 = vld [vmem:[#allocation4 + $0x158] sm:$0xff] }
  0x31   :  { %v314_v34 = vadd.f32 %v290_v24, %v146_v23  ;;  %v134_v36 = vadd.f32 %v110_v32, %v86_v31  ;;  %v374_v39 = vld [vmem:[#allocation4 + $0x160] sm:$0xff]  ;;  %692 = vadd.xlane.f32.xlu1 %v601_v28  ;;  %v278_v40 = vadd.f32 %v254_v38, %v230_v37  ;;  %v398_v41 = vld [vmem:[#allocation4 + $0x168] sm:$0xff]  ;;  %v518_v42 = vld [vmem:[#allocation4 + $0x170] sm:$0xff] }
  0x32   :  { %v542_v43 = vld [vmem:[#allocation4 + $0x178] sm:$0xff]  ;;  %v589_v44 = vadd.f32 %v565_v22, %v445_v33  ;;  %v422_v46 = vadd.f32 %v398_v41, %v374_v39  ;;  %v99_v47 = vld [vmem:[#allocation4 + $0x480] sm:$0xff]  ;;  %v123_v48 = vld [vmem:[#allocation4 + $0x488] sm:$0xff] }
  0x33   :  { %v458_v45 = vadd.f32 %v434_v29, %v314_v34  ;;  %v243_v49 = vld [vmem:[#allocation4 + $0x490] sm:$0xff]  ;;  %v302_v50 = vadd.f32 %v278_v40, %v134_v36  ;;  %v566_v51 = vadd.f32 %v542_v43, %v518_v42  ;;  %v147_v52 = vadd.f32 %v123_v48, %v99_v47  ;;  %v267_v53 = vld [vmem:[#allocation4 + $0x498] sm:$0xff]  ;;  %v387_v54 = vld [vmem:[#allocation4 + $0x4a0] sm:$0xff] }
  0x34   :  { %v411_v55 = vld [vmem:[#allocation4 + $0x4a8] sm:$0xff]  ;;  %668 = vadd.xlane.f32.xlu0 %v589_v44  ;;  %v291_v57 = vadd.f32 %v267_v53, %v243_v49  ;;  %v531_v59 = vld [vmem:[#allocation4 + $0x4b0] sm:$0xff]  ;;  %v555_v60 = vld [vmem:[#allocation4 + $0x4b8] sm:$0xff] }
  0x35   :  { %v602_v56 = vadd.f32 %v578_v35, %v458_v45  ;;  %v435_v58 = vadd.f32 %v411_v55, %v387_v54  ;;  %v87_v61 = vld [vmem:[#allocation4 + $0x180] sm:$0xff]  ;;  %v446_v62 = vadd.f32 %v422_v46, %v302_v50  ;;  %v111_v63 = vld [vmem:[#allocation4 + $0x188] sm:$0xff]  ;;  %v231_v0 = vld [vmem:[#allocation4 + $0x190] sm:$0xff]  ;;  %v579_v3 = vadd.f32 %v555_v60, %v531_v59 }
  0x36   :  { %v255_v1 = vld [vmem:[#allocation4 + $0x198] sm:$0xff]  ;;  %v315_v2 = vadd.f32 %v291_v57, %v147_v52  ;;  %v135_v4 = vadd.f32 %v111_v63, %v87_v61  ;;  %v375_v6 = vld [vmem:[#allocation4 + $0x1a0] sm:$0xff]  ;;  %v399_v7 = vld [vmem:[#allocation4 + $0x1a8] sm:$0xff] }
  0x37   :  { %694 = vadd.xlane.f32.xlu1 %v602_v56  ;;  %v279_v5 = vadd.f32 %v255_v1, %v231_v0  ;;  %v519_v8 = vld [vmem:[#allocation4 + $0x1b0] sm:$0xff]  ;;  %v590_v9 = vadd.f32 %v566_v51, %v446_v62  ;;  %v423_v10 = vadd.f32 %v399_v7, %v375_v6  ;;  %v543_v11 = vld [vmem:[#allocation4 + $0x1b8] sm:$0xff]  ;;  %v100_v12 = vld [vmem:[#allocation4 + $0x4c0] sm:$0xff] }
  0x38   :  { %v124_v13 = vld [vmem:[#allocation4 + $0x4c8] sm:$0xff]  ;;  %v459_v14 = vadd.f32 %v435_v58, %v315_v2  ;;  %v567_v16 = vadd.f32 %v543_v11, %v519_v8  ;;  %v244_v18 = vld [vmem:[#allocation4 + $0x4d0] sm:$0xff]  ;;  %v268_v19 = vld [vmem:[#allocation4 + $0x4d8] sm:$0xff] }
  0x39   :  { %v303_v15 = vadd.f32 %v279_v5, %v135_v4  ;;  %v148_v17 = vadd.f32 %v124_v13, %v100_v12  ;;  %v388_v20 = vld [vmem:[#allocation4 + $0x4e0] sm:$0xff]  ;;  %670 = vadd.xlane.f32.xlu0 %v590_v9  ;;  %v292_v21 = vadd.f32 %v268_v19, %v244_v18  ;;  %v412_v22 = vld [vmem:[#allocation4 + $0x4e8] sm:$0xff]  ;;  %v532_v23 = vld [vmem:[#allocation4 + $0x4f0] sm:$0xff] }
  0x3a   :  { %v556_v24 = vld [vmem:[#allocation4 + $0x4f8] sm:$0xff]  ;;  %v603_v25 = vadd.f32 %v579_v3, %v459_v14  ;;  %v436_v27 = vadd.f32 %v412_v22, %v388_v20  ;;  %v88_v28 = vld [vmem:[#allocation4 + $0x1c0] sm:$0xff]  ;;  %v112_v29 = vld [vmem:[#allocation4 + $0x1c8] sm:$0xff] }
  0x3b   :  { %v447_v26 = vadd.f32 %v423_v10, %v303_v15  ;;  %v232_v30 = vld [vmem:[#allocation4 + $0x1d0] sm:$0xff]  ;;  %v316_v31 = vadd.f32 %v292_v21, %v148_v17  ;;  %v580_v32 = vadd.f32 %v556_v24, %v532_v23  ;;  %v136_v33 = vadd.f32 %v112_v29, %v88_v28  ;;  %v256_v34 = vld [vmem:[#allocation4 + $0x1d8] sm:$0xff]  ;;  %v376_v35 = vld [vmem:[#allocation4 + $0x1e0] sm:$0xff] }
  0x3c   :  { %v400_v36 = vld [vmem:[#allocation4 + $0x1e8] sm:$0xff]  ;;  %696 = vadd.xlane.f32.xlu1 %v603_v25  ;;  %v280_v38 = vadd.f32 %v256_v34, %v232_v30  ;;  %v520_v40 = vld [vmem:[#allocation4 + $0x1f0] sm:$0xff]  ;;  %v544_v41 = vld [vmem:[#allocation4 + $0x1f8] sm:$0xff] }
  0x3d   :  { %v591_v37 = vadd.f32 %v567_v16, %v447_v26  ;;  %v424_v39 = vadd.f32 %v400_v36, %v376_v35  ;;  %v101_v42 = vld [vmem:[#allocation4 + $0x500] sm:$0xff]  ;;  %v460_v43 = vadd.f32 %v436_v27, %v316_v31  ;;  %v125_v44 = vld [vmem:[#allocation4 + $0x508] sm:$0xff]  ;;  %v245_v45 = vld [vmem:[#allocation4 + $0x510] sm:$0xff]  ;;  %v568_v48 = vadd.f32 %v544_v41, %v520_v40 }
  0x3e   :  { %v269_v46 = vld [vmem:[#allocation4 + $0x518] sm:$0xff]  ;;  %v304_v47 = vadd.f32 %v280_v38, %v136_v33  ;;  %v149_v49 = vadd.f32 %v125_v44, %v101_v42  ;;  %v389_v51 = vld [vmem:[#allocation4 + $0x520] sm:$0xff]  ;;  %v413_v52 = vld [vmem:[#allocation4 + $0x528] sm:$0xff] }
  0x3f   :  { %672 = vadd.xlane.f32.xlu0 %v591_v37  ;;  %v293_v50 = vadd.f32 %v269_v46, %v245_v45  ;;  %v533_v53 = vld [vmem:[#allocation4 + $0x530] sm:$0xff]  ;;  %v604_v54 = vadd.f32 %v580_v32, %v460_v43  ;;  %v437_v55 = vadd.f32 %v413_v52, %v389_v51  ;;  %v557_v56 = vld [vmem:[#allocation4 + $0x538] sm:$0xff]  ;;  %v89_v57 = vld [vmem:[#allocation4 + $0x200] sm:$0xff] }
  0x40   :  { %v113_v58 = vld [vmem:[#allocation4 + $0x208] sm:$0xff]  ;;  %v448_v59 = vadd.f32 %v424_v39, %v304_v47  ;;  %v581_v61 = vadd.f32 %v557_v56, %v533_v53  ;;  %v233_v63 = vld [vmem:[#allocation4 + $0x210] sm:$0xff]  ;;  %v257_v0 = vld [vmem:[#allocation4 + $0x218] sm:$0xff] }
  0x41   :  { %v317_v60 = vadd.f32 %v293_v50, %v149_v49  ;;  %v137_v62 = vadd.f32 %v113_v58, %v89_v57  ;;  %v377_v1 = vld [vmem:[#allocation4 + $0x220] sm:$0xff]  ;;  %698 = vadd.xlane.f32.xlu1 %v604_v54  ;;  %v281_v2 = vadd.f32 %v257_v0, %v233_v63  ;;  %v401_v3 = vld [vmem:[#allocation4 + $0x228] sm:$0xff]  ;;  %v521_v4 = vld [vmem:[#allocation4 + $0x230] sm:$0xff] }
  0x42   :  { %v545_v5 = vld [vmem:[#allocation4 + $0x238] sm:$0xff]  ;;  %v592_v6 = vadd.f32 %v568_v48, %v448_v59  ;;  %v425_v8 = vadd.f32 %v401_v3, %v377_v1  ;;  %v102_v9 = vld [vmem:[#allocation4 + $0x540] sm:$0xff]  ;;  %v126_v10 = vld [vmem:[#allocation4 + $0x548] sm:$0xff] }
  0x43   :  { %v461_v7 = vadd.f32 %v437_v55, %v317_v60  ;;  %v246_v11 = vld [vmem:[#allocation4 + $0x550] sm:$0xff]  ;;  %v305_v12 = vadd.f32 %v281_v2, %v137_v62  ;;  %v569_v13 = vadd.f32 %v545_v5, %v521_v4  ;;  %v150_v14 = vadd.f32 %v126_v10, %v102_v9  ;;  %v270_v15 = vld [vmem:[#allocation4 + $0x558] sm:$0xff]  ;;  %v390_v16 = vld [vmem:[#allocation4 + $0x560] sm:$0xff] }
  0x44   :  { %v414_v17 = vld [vmem:[#allocation4 + $0x568] sm:$0xff]  ;;  %674 = vadd.xlane.f32.xlu0 %v592_v6  ;;  %v294_v19 = vadd.f32 %v270_v15, %v246_v11  ;;  %v534_v21 = vld [vmem:[#allocation4 + $0x570] sm:$0xff]  ;;  %v558_v22 = vld [vmem:[#allocation4 + $0x578] sm:$0xff] }
  0x45   :  { %v605_v18 = vadd.f32 %v581_v61, %v461_v7  ;;  %v438_v20 = vadd.f32 %v414_v17, %v390_v16  ;;  %v90_v23 = vld [vmem:[#allocation4 + $0x240] sm:$0xff]  ;;  %v449_v24 = vadd.f32 %v425_v8, %v305_v12  ;;  %v114_v25 = vld [vmem:[#allocation4 + $0x248] sm:$0xff]  ;;  %v234_v26 = vld [vmem:[#allocation4 + $0x250] sm:$0xff]  ;;  %v582_v29 = vadd.f32 %v558_v22, %v534_v21 }
  0x46   :  { %v258_v27 = vld [vmem:[#allocation4 + $0x258] sm:$0xff]  ;;  %v318_v28 = vadd.f32 %v294_v19, %v150_v14  ;;  %v138_v30 = vadd.f32 %v114_v25, %v90_v23  ;;  %v378_v32 = vld [vmem:[#allocation4 + $0x260] sm:$0xff]  ;;  %v402_v33 = vld [vmem:[#allocation4 + $0x268] sm:$0xff] }
  0x47   :  { %700 = vadd.xlane.f32.xlu1 %v605_v18  ;;  %v282_v31 = vadd.f32 %v258_v27, %v234_v26  ;;  %v522_v34 = vld [vmem:[#allocation4 + $0x270] sm:$0xff]  ;;  %v593_v35 = vadd.f32 %v569_v13, %v449_v24  ;;  %v426_v36 = vadd.f32 %v402_v33, %v378_v32  ;;  %v546_v37 = vld [vmem:[#allocation4 + $0x278] sm:$0xff]  ;;  %v103_v38 = vld [vmem:[#allocation4 + $0x580] sm:$0xff] }
  0x48   :  { %v127_v39 = vld [vmem:[#allocation4 + $0x588] sm:$0xff]  ;;  %v462_v40 = vadd.f32 %v438_v20, %v318_v28  ;;  %v570_v42 = vadd.f32 %v546_v37, %v522_v34  ;;  %v247_v44 = vld [vmem:[#allocation4 + $0x590] sm:$0xff]  ;;  %v271_v45 = vld [vmem:[#allocation4 + $0x598] sm:$0xff] }
  0x49   :  { %v306_v41 = vadd.f32 %v282_v31, %v138_v30  ;;  %v151_v43 = vadd.f32 %v127_v39, %v103_v38  ;;  %v391_v46 = vld [vmem:[#allocation4 + $0x5a0] sm:$0xff]  ;;  %676 = vadd.xlane.f32.xlu0 %v593_v35  ;;  %v295_v47 = vadd.f32 %v271_v45, %v247_v44  ;;  %v415_v48 = vld [vmem:[#allocation4 + $0x5a8] sm:$0xff]  ;;  %v535_v49 = vld [vmem:[#allocation4 + $0x5b0] sm:$0xff] }
  0x4a   :  { %v559_v50 = vld [vmem:[#allocation4 + $0x5b8] sm:$0xff]  ;;  %v606_v51 = vadd.f32 %v582_v29, %v462_v40  ;;  %v439_v53 = vadd.f32 %v415_v48, %v391_v46  ;;  %v91_v54 = vld [vmem:[#allocation4 + $0x280] sm:$0xff]  ;;  %v115_v55 = vld [vmem:[#allocation4 + $0x288] sm:$0xff] }
  0x4b   :  { %v450_v52 = vadd.f32 %v426_v36, %v306_v41  ;;  %v235_v56 = vld [vmem:[#allocation4 + $0x290] sm:$0xff]  ;;  %v319_v57 = vadd.f32 %v295_v47, %v151_v43  ;;  %v583_v58 = vadd.f32 %v559_v50, %v535_v49  ;;  %v139_v59 = vadd.f32 %v115_v55, %v91_v54  ;;  %v259_v60 = vld [vmem:[#allocation4 + $0x298] sm:$0xff]  ;;  %v379_v61 = vld [vmem:[#allocation4 + $0x2a0] sm:$0xff] }
  0x4c   :  { %v403_v62 = vld [vmem:[#allocation4 + $0x2a8] sm:$0xff]  ;;  %702 = vadd.xlane.f32.xlu1 %v606_v51  ;;  %v283_v0 = vadd.f32 %v259_v60, %v235_v56  ;;  %v523_v2 = vld [vmem:[#allocation4 + $0x2b0] sm:$0xff]  ;;  %v547_v3 = vld [vmem:[#allocation4 + $0x2b8] sm:$0xff]  ;;  %v1110_v41 = vmov 0  }
  0x4d   :  { %v594_v63 = vadd.f32 %v570_v42, %v450_v52  ;;  %v427_v1 = vadd.f32 %v403_v62, %v379_v61  ;;  %v104_v4 = vld [vmem:[#allocation4 + $0x5c0] sm:$0xff]  ;;  %v463_v5 = vadd.f32 %v439_v53, %v319_v57  ;;  %v128_v6 = vld [vmem:[#allocation4 + $0x5c8] sm:$0xff]  ;;  %v248_v7 = vld [vmem:[#allocation4 + $0x5d0] sm:$0xff]  ;;  %v571_v10 = vadd.f32 %v547_v3, %v523_v2  ;;  %1082 = vset.pattern.permute.xlu1 %v1110_v41 }
  0x4e   :  { %v272_v8 = vld [vmem:[#allocation4 + $0x5d8] sm:$0xff]  ;;  %v307_v9 = vadd.f32 %v283_v0, %v139_v59  ;;  %v152_v11 = vadd.f32 %v128_v6, %v104_v4  ;;  %v392_v13 = vld [vmem:[#allocation4 + $0x5e0] sm:$0xff]  ;;  %v416_v14 = vld [vmem:[#allocation4 + $0x5e8] sm:$0xff]  ;;  %1081 = vset.pattern.permute.xlu0 %v1110_v41 }
  0x4f   :  { %678 = vadd.xlane.f32.xlu0 %v594_v63  ;;  %v296_v12 = vadd.f32 %v272_v8, %v248_v7  ;;  %v536_v15 = vld [vmem:[#allocation4 + $0x5f0] sm:$0xff]  ;;  %v607_v16 = vadd.f32 %v583_v58, %v463_v5  ;;  %v440_v17 = vadd.f32 %v416_v14, %v392_v13  ;;  %v560_v18 = vld [vmem:[#allocation4 + $0x5f8] sm:$0xff]  ;;  %v92_v19 = vld [vmem:[#allocation4 + $0x2c0] sm:$0xff] }
  0x50   :  { %v116_v20 = vld [vmem:[#allocation4 + $0x2c8] sm:$0xff]  ;;  %v451_v21 = vadd.f32 %v427_v1, %v307_v9  ;;  %v584_v23 = vadd.f32 %v560_v18, %v536_v15  ;;  %v236_v25 = vld [vmem:[#allocation4 + $0x2d0] sm:$0xff]  ;;  %v260_v26 = vld [vmem:[#allocation4 + $0x2d8] sm:$0xff] }
  0x51   :  { %v320_v22 = vadd.f32 %v296_v12, %v152_v11  ;;  %v140_v24 = vadd.f32 %v116_v20, %v92_v19  ;;  %v380_v27 = vld [vmem:[#allocation4 + $0x2e0] sm:$0xff]  ;;  %704 = vadd.xlane.f32.xlu1 %v607_v16  ;;  %v284_v28 = vadd.f32 %v260_v26, %v236_v25  ;;  %v404_v29 = vld [vmem:[#allocation4 + $0x2e8] sm:$0xff]  ;;  %v524_v30 = vld [vmem:[#allocation4 + $0x2f0] sm:$0xff] }
  0x52   :  { %v548_v31 = vld [vmem:[#allocation4 + $0x2f8] sm:$0xff]  ;;  %v595_v32 = vadd.f32 %v571_v10, %v451_v21  ;;  %v428_v34 = vadd.f32 %v404_v29, %v380_v27  ;;  %v1076_v40 = vld [vmem:[%s1241_s1] ss:$0 sm:$0xff] }
  0x53   :  { %v464_v33 = vadd.f32 %v440_v17, %v320_v22  ;;  %v308_v35 = vadd.f32 %v284_v28, %v140_v24  ;;  %v572_v36 = vadd.f32 %v548_v31, %v524_v30 }
  0x54   :  { %680 = vadd.xlane.f32.xlu0 %v595_v32 }
  0x55   :  { %v608_v37 = vadd.f32 %v584_v23, %v464_v33  ;;  %v452_v38 = vadd.f32 %v428_v34, %v308_v35 }
  0x57   :  { %706 = vadd.xlane.f32.xlu1 %v608_v37  ;;  %v596_v39 = vadd.f32 %v572_v36, %v452_v38 }
  0x59   :  { %682 = vadd.xlane.f32.xlu0 %v596_v39 }
  0x68   :  { %743 = vbcast.lane.b32.xlu1 %v1076_v40, 264 }
  0x6c   :  { %747 = vbcast.lane.b32.xlu1 %v1076_v40, 272 }
  0x6f   :  { %739 = vbcast.lane.b32.xlu0 %v1076_v40, 256 }
  0x70   :  { %751 = vbcast.lane.b32.xlu1 %v1076_v40, 280 }
  0x73   :  { %755 = vbcast.lane.b32.xlu0 %v1076_v40, 288 }
  0x74   :  { %759 = vbcast.lane.b32.xlu1 %v1076_v40, 296 }
  0x77   :  { %763 = vbcast.lane.b32.xlu0 %v1076_v40, 304 }
  0x78   :  { %767 = vbcast.lane.b32.xlu1 %v1076_v40, 312 }
  0x7b   :  { %771 = vbcast.lane.b32.xlu0 %v1076_v40, 320 }
  0x7c   :  { %775 = vbcast.lane.b32.xlu1 %v1076_v40, 328 }
  0x7f   :  { %779 = vbcast.lane.b32.xlu0 %v1076_v40, 336 }
  0x80   :  { %783 = vbcast.lane.b32.xlu1 %v1076_v40, 344 }
  0xa9   :  { %v685_v42 = vpop.xlane.xlu1 %684 }
  0xaa   :  { %v720_v6 = vmul.f32 0.0009765625, %v685_v42 }
  0xac   :  { %v661_v43 = vpop.xlane.xlu0 %660 }
  0xad   :  { %v708_v5 = vmul.f32 0.0009765625, %v661_v43 }
  0xae   :  { %v687_v44 = vpop.xlane.xlu1 %686 }
  0xaf   :  { %v721_v11 = vmul.f32 0.0009765625, %v687_v44 }
  0xb1   :  { %v663_v45 = vpop.xlane.xlu0 %662 }
  0xb2   :  { %v709_v1 = vmul.f32 0.0009765625, %v663_v45 }
  0xb4   :  { %v689_v46 = vpop.xlane.xlu1 %688 }
  0xb5   :  { %v722_v15 = vmul.f32 0.0009765625, %v689_v46 }
  0xb6   :  { %v665_v47 = vpop.xlane.xlu0 %664 }
  0xb7   :  { %v710_v12 = vmul.f32 0.0009765625, %v665_v47 }
  0xb9   :  { %v691_v48 = vpop.xlane.xlu1 %690 }
  0xba   :  { %v723_v20 = vmul.f32 0.0009765625, %v691_v48 }
  0xbc   :  { %v667_v49 = vpop.xlane.xlu0 %666 }
  0xbd   :  { %v711_v17 = vmul.f32 0.0009765625, %v667_v49 }
  0xbe   :  { %v693_v50 = vpop.xlane.xlu1 %692 }
  0xbf   :  { %v724_v25 = vmul.f32 0.0009765625, %v693_v50 }
  0xc1   :  { %v669_v51 = vpop.xlane.xlu0 %668 }
  0xc2   :  { %v712_v22 = vmul.f32 0.0009765625, %v669_v51 }
  0xc4   :  { %v695_v52 = vpop.xlane.xlu1 %694 }
  0xc5   :  { %v725_v30 = vmul.f32 0.0009765625, %v695_v52 }
  0xc6   :  { %v671_v53 = vpop.xlane.xlu0 %670 }
  0xc7   :  { %v713_v27 = vmul.f32 0.0009765625, %v671_v53 }
  0xc9   :  { %v697_v54 = vpop.xlane.xlu1 %696 }
  0xca   :  { %v726_v35 = vmul.f32 0.0009765625, %v697_v54 }
  0xcc   :  { %v673_v55 = vpop.xlane.xlu0 %672 }
  0xcd   :  { %v714_v32 = vmul.f32 0.0009765625, %v673_v55 }
  0xce   :  { %v699_v56 = vpop.xlane.xlu1 %698 }
  0xcf   :  { %v727_v40 = vmul.f32 0.0009765625, %v699_v56 }
  0xd1   :  { %v675_v57 = vpop.xlane.xlu0 %674 }
  0xd2   :  { %v715_v37 = vmul.f32 0.0009765625, %v675_v57 }
  0xd4   :  { %v1146_v58 = vpop.xlane.xlu1 %700 }
  0xd5   :  { %v728_v45 = vmul.f32 0.0009765625, %v1146_v58 }
  0xd6   :  { %v677_v59 = vpop.xlane.xlu0 %676 }
  0xd7   :  { %v716_v42 = vmul.f32 0.0009765625, %v677_v59 }
  0xd9   :  { %v1148_v60 = vpop.xlane.xlu1 %702 }
  0xda   :  { %v729_v50 = vmul.f32 0.0009765625, %v1148_v60 }
  0xdc   :  { %v1150_v61 = vpop.xlane.xlu0 %678 }
  0xdd   :  { %v717_v47 = vmul.f32 0.0009765625, %v1150_v61 }
  0xde   :  { %v1152_v62 = vpop.xlane.xlu1 %704 }
  0xdf   :  { %v730_v55 = vmul.f32 0.0009765625, %v1152_v62 }
  0xe1   :  { %v1154_v63 = vpop.xlane.xlu0 %680 }
  0xe2   :  { %v718_v52 = vmul.f32 0.0009765625, %v1154_v63 }
  0xe4   :  { %v1156_v0 = vpop.xlane.xlu1 %706 }
  0xe5   :  { %v731_v61 = vmul.f32 0.0009765625, %v1156_v0 }
  0xe6   :  { %v1158_v2 = vpop.xlane.xlu0 %682 }
  0xe7   :  { %v719_v57 = vmul.f32 0.0009765625, %v1158_v2 }
  0xe8   :  { %v744_v3 = vpop.permute.xlu1 %743 }
  0xe9   :  { %v798_v4 = vmul.f32 %v744_v3, %v709_v1  ;;  %v810_v13 = vmul.f32 %v744_v3, %v721_v11 }
  0xea   :  { %v740_v7 = vpop.permute.xlu0 %739 }
  0xeb   :  { %849 = vperm.xlu1 %1082, %v798_v4   ;;  %v797_v8 = vmul.f32 %v740_v7, %v708_v5  ;;  %v809_v10 = vmul.f32 %v740_v7, %v720_v6  ;;  %v917_v7 = vlaneseq }
  0xec   :  { %v748_v9 = vpop.permute.xlu1 %747 }
  0xed   :  { %846 = vperm.xlu0 %1081, %v797_v8   ;;  %v799_v14 = vmul.f32 %v748_v9, %v710_v12  ;;  %v811_v18 = vmul.f32 %v748_v9, %v722_v15 }
  0xee   :  { %v756_v21 = vpop.permute.xlu0 %755 }
  0xef   :  { %882 = vperm.xlu1 %1082, %v809_v10   ;;  %v801_v24 = vmul.f32 %v756_v21, %v712_v22  ;;  %v813_v28 = vmul.f32 %v756_v21, %v724_v25  ;;  %v918_v10 = vand.u32 127, %v917_v7 }
  0xf0   :  { %v752_v16 = vpop.permute.xlu1 %751 }
  0xf1   :  { %885 = vperm.xlu0 %1081, %v810_v13   ;;  %v800_v19 = vmul.f32 %v752_v16, %v711_v17  ;;  %v812_v23 = vmul.f32 %v752_v16, %v723_v20  ;;  %v920_v13 = vshrl.u32 %v917_v7, 7  ;;  %v930_v15 = vadd.s32 4294967280, %v918_v10 }
  0xf2   :  { %v764_v31 = vpop.permute.xlu0 %763  ;;  %v937_v16 = vadd.s32 4294967272, %v918_v10  ;;  %v958_v22 = vadd.s32 4294967248, %v918_v10  ;;  %v965_v25 = vadd.s32 4294967240, %v918_v10 }
  0xf3   :  { %852 = vperm.xlu1 %1082, %v799_v14   ;;  %v803_v34 = vmul.f32 %v764_v31, %v714_v32  ;;  %v815_v38 = vmul.f32 %v764_v31, %v726_v35  ;;  %v923_v14 = vadd.s32 4294967288, %v918_v10  ;;  %v979_v32 = vadd.s32 4294967224, %v918_v10 }
  0xf4   :  { %v760_v26 = vpop.permute.xlu1 %759 }
  0xf5   :  { %888 = vperm.xlu0 %1081, %v811_v18   ;;  %v802_v29 = vmul.f32 %v760_v26, %v713_v27  ;;  %v814_v33 = vmul.f32 %v760_v26, %v725_v30  ;;  %v944_v18 = vadd.s32 4294967264, %v918_v10  ;;  %v926_v21 = vsub.s32 %v923_v14, %v920_v13 }
  0xf6   :  { %v772_v41 = vpop.permute.xlu0 %771  ;;  %v940_v26 = vsub.s32 %v937_v16, %v920_v13 }
  0xf7   :  { %855 = vperm.xlu1 %1082, %v800_v19   ;;  %v805_v44 = vmul.f32 %v772_v41, %v716_v42  ;;  %v817_v48 = vmul.f32 %v772_v41, %v728_v45  ;;  %v951_v19 = vadd.s32 4294967256, %v918_v10  ;;  %v993_v41 = vadd.s32 4294967208, %v918_v10 }
  0xf8   :  { %v768_v36 = vpop.permute.xlu1 %767  ;;  %v982_v45 = vsub.s32 %v979_v32, %v920_v13  ;;  %v1067_v32 = vstv %s1242_s2 }
  0xf9   :  { %891 = vperm.xlu0 %1081, %v812_v23   ;;  %v804_v39 = vmul.f32 %v768_v36, %v715_v37  ;;  %v816_v43 = vmul.f32 %v768_v36, %v727_v40  ;;  %v921_v23 = vsub.s32 %v918_v10, %v920_v13  ;;  %v954_v30 = vsub.s32 %v951_v19, %v920_v13 }
  0xfa   :  { %v780_v51 = vpop.permute.xlu0 %779  ;;  %v968_v37 = vsub.s32 %v965_v25, %v920_v13 }
  0xfb   :  { %858 = vperm.xlu1 %1082, %v801_v24   ;;  %v807_v54 = vmul.f32 %v780_v51, %v718_v52  ;;  %v819_v58 = vmul.f32 %v780_v51, %v730_v55  ;;  %v933_v24 = vsub.s32 %v930_v15, %v920_v13 }
  0xfc   :  { %v776_v46 = vpop.permute.xlu1 %775 }
  0xfd   :  { %894 = vperm.xlu0 %1081, %v813_v28   ;;  %v806_v49 = vmul.f32 %v776_v46, %v717_v47  ;;  %v818_v53 = vmul.f32 %v776_v46, %v729_v50  ;;  %v972_v28 = vadd.s32 4294967232, %v918_v10 }
  0xff   :  { %861 = vperm.xlu1 %1082, %v802_v29   ;;  %v947_v29 = vsub.s32 %v944_v18, %v920_v13 }
 0x100   :  { %v784_v56 = vpop.permute.xlu1 %783 }
 0x101   :  { %897 = vperm.xlu0 %1081, %v814_v33   ;;  %v808_v59 = vmul.f32 %v784_v56, %v719_v57  ;;  %v820_v60 = vmul.f32 %v784_v56, %v731_v61  ;;  %v961_v33 = vsub.s32 %v958_v22, %v920_v13  ;;  %v996_v57 = vsub.s32 %v993_v41, %v920_v13 }
 0x103   :  { %864 = vperm.xlu1 %1082, %v803_v34   ;;  %v986_v34 = vadd.s32 4294967216, %v918_v10 }
 0x105   :  { %900 = vperm.xlu0 %1081, %v815_v38  }
 0x107   :  { %867 = vperm.xlu1 %1082, %v804_v39   ;;  %v975_v39 = vsub.s32 %v972_v28, %v920_v13 }
 0x109   :  { %903 = vperm.xlu0 %1081, %v816_v43  }
 0x10b   :  { %870 = vperm.xlu1 %1082, %v805_v44  }
 0x10d   :  { %906 = vperm.xlu0 %1081, %v817_v48  }
 0x10f   :  { %873 = vperm.xlu1 %1082, %v806_v49   ;;  %v989_v49 = vsub.s32 %v986_v34, %v920_v13 }
 0x111   :  { %909 = vperm.xlu0 %1081, %v818_v53  }
 0x113   :  { %876 = vperm.xlu1 %1082, %v807_v54  }
 0x115   :  { %912 = vperm.xlu0 %1081, %v819_v58  }
 0x117   :  { %879 = vperm.xlu1 %1082, %v808_v59  }
 0x119   :  { %915 = vperm.xlu0 %1081, %v820_v60  }
 0x16a   :  { %v1167_v1 = vpop.permute.xlu1 %849 }
 0x16b   :  { %v927_v35 = vrot.slane %v1167_v1, %v926_v21 }
 0x16c   :  { %v847_v63 = vpop.permute.xlu0 %846 }
 0x16d   :  { %v922_v36 = vrot.slane %v847_v63, %v921_v23 }
 0x16e   :  { %v1169_v3 = vpop.permute.xlu1 %882 }
 0x16f   :  { %v1003_v42 = vrot.slane %v1169_v3, %v921_v23  ;;  %v929_v50 = vsel %vm928_vm0, %v927_v35, %v922_v36 }
 0x170   :  { %v1171_v4 = vpop.permute.xlu0 %885 }
 0x171   :  { %v1007_v43 = vrot.slane %v1171_v4, %v926_v21 }
 0x172   :  { %v1173_v62 = vpop.permute.xlu1 %852 }
 0x173   :  { %v934_v38 = vrot.slane %v1173_v62, %v933_v24  ;;  %v1008_v58 = vsel %vm928_vm0, %v1007_v43, %v1003_v42 }
 0x174   :  { %v1175_v5 = vpop.permute.xlu0 %888 }
 0x175   :  { %v1012_v47 = vrot.slane %v1175_v5, %v933_v24  ;;  %v936_v53 = vsel %vm935_vm1, %v934_v38, %v929_v50 }
 0x176   :  { %v1177_v2 = vpop.permute.xlu1 %855 }
 0x177   :  { %v941_v44 = vrot.slane %v1177_v2, %v940_v26  ;;  %v1013_v63 = vsel %vm935_vm1, %v1012_v47, %v1008_v58 }
 0x178   :  { %v1179_v6 = vpop.permute.xlu0 %891 }
 0x179   :  { %v1017_v51 = vrot.slane %v1179_v6, %v940_v26  ;;  %v943_v59 = vsel %vm942_vm2, %v941_v44, %v936_v53 }
 0x17a   :  { %v1181_v0 = vpop.permute.xlu1 %858 }
 0x17b   :  { %v948_v48 = vrot.slane %v1181_v0, %v947_v29  ;;  %v1018_v5 = vsel %vm942_vm2, %v1017_v51, %v1013_v63 }
 0x17c   :  { %v1183_v8 = vpop.permute.xlu0 %894 }
 0x17d   :  { %v1022_v54 = vrot.slane %v1183_v8, %v947_v29  ;;  %v950_v3 = vsel %vm949_vm3, %v948_v48, %v943_v59 }
 0x17e   :  { %v1185_v9 = vpop.permute.xlu1 %861 }
 0x17f   :  { %v955_v52 = vrot.slane %v1185_v9, %v954_v30  ;;  %v1023_v7 = vsel %vm949_vm3, %v1022_v54, %v1018_v5 }
 0x180   :  { %v1187_v11 = vpop.permute.xlu0 %897 }
 0x181   :  { %v1027_v61 = vrot.slane %v1187_v11, %v954_v30  ;;  %v957_v2 = vsel %vm956_vm4, %v955_v52, %v950_v3 }
 0x182   :  { %v1189_v12 = vpop.permute.xlu1 %864 }
 0x183   :  { %v962_v55 = vrot.slane %v1189_v12, %v961_v33  ;;  %v1028_v12 = vsel %vm956_vm4, %v1027_v61, %v1023_v7 }
 0x184   :  { %v1191_v17 = vpop.permute.xlu0 %900 }
 0x185   :  { %v1032_v4 = vrot.slane %v1191_v17, %v961_v33  ;;  %v964_v8 = vsel %vm963_vm5, %v962_v55, %v957_v2 }
 0x186   :  { %v1193_v20 = vpop.permute.xlu1 %867 }
 0x187   :  { %v969_v60 = vrot.slane %v1193_v20, %v968_v37  ;;  %v1033_v16 = vsel %vm963_vm5, %v1032_v4, %v1028_v12 }
 0x188   :  { %v1195_v27 = vpop.permute.xlu0 %903 }
 0x189   :  { %v1037_v6 = vrot.slane %v1195_v27, %v968_v37  ;;  %v971_v13 = vsel %vm970_vm6, %v969_v60, %v964_v8 }
 0x18a   :  { %v871_v31 = vpop.permute.xlu1 %870 }
 0x18b   :  { %v976_v62 = vrot.slane %v871_v31, %v975_v39  ;;  %v1038_v20 = vsel %vm970_vm6, %v1037_v6, %v1033_v16 }
 0x18c   :  { %v907_v40 = vpop.permute.xlu0 %906 }
 0x18d   :  { %v1042_v9 = vrot.slane %v907_v40, %v975_v39  ;;  %v978_v17 = vsel %vm977_vm7, %v976_v62, %v971_v13 }
 0x18e   :  { %v874_v46 = vpop.permute.xlu1 %873 }
 0x18f   :  { %v983_v0 = vrot.slane %v874_v46, %v982_v45  ;;  %v1043_v22 = vsel %vm977_vm7, %v1042_v9, %v1038_v20 }
 0x190   :  { %v910_v56 = vpop.permute.xlu0 %909 }
 0x191   :  { %v1047_v14 = vrot.slane %v910_v56, %v982_v45  ;;  %v985_v21 = vsel %vm984_vm8, %v983_v0, %v978_v17 }
 0x192   :  { %v877_v1 = vpop.permute.xlu1 %876 }
 0x193   :  { %v990_v10 = vrot.slane %v877_v1, %v989_v49  ;;  %v1048_v25 = vsel %vm984_vm8, %v1047_v14, %v1043_v22 }
 0x194   :  { %v913_v11 = vpop.permute.xlu0 %912 }
 0x195   :  { %v1052_v18 = vrot.slane %v913_v11, %v989_v49  ;;  %v992_v23 = vsel %vm991_vm9, %v990_v10, %v985_v21 }
 0x196   :  { %v880_v15 = vpop.permute.xlu1 %879 }
 0x197   :  { %v997_v19 = vrot.slane %v880_v15, %v996_v57  ;;  %v1053_v28 = vsel %vm991_vm9, %v1052_v18, %v1048_v25 }
 0x198   :  { %v916_v24 = vpop.permute.xlu0 %915 }
 0x199   :  { %v1057_v26 = vrot.slane %v916_v24, %v996_v57  ;;  %v999_v27 = vsel %vm998_vm10, %v997_v19, %v992_v23 }
 0x19b   :  { %v1058_v29 = vsel %vm998_vm10, %v1057_v26, %v1053_v28 }
 0x19c   :  { %v1060_v30 = vsel %vm1059_vm11, %v1058_v29, %v999_v27 }
 0x19d   :  { %v1063_v31 = vsel %vm1062_vm12, %v1060_v30, 0.0 }
 0x19e   :  { %1064 = vadd.xlane.f32.xlu1 %v1063_v31 }
 0x22b   :  { %v1065_v33 = vpop.xlane.xlu1 %1064 }
 0x22c   :  { %v1068_v34 = vadd.f32 %v1067_v32, %v1065_v33 }
 0x22e   :  { %1070 = vst.msk [vmem:[%s1243_s3] sm:$0x3] %vm1069_vm13, %v1068_v34 }
 0x22f   :  { %1075 = vsyncpa [#allocation5], 1 }

</bundles_post_ra>
